<compile_context>
chip_gen: v5e
topology: v5e:2x2
jax: 0.10.0
libtpu: 0.0.40
codegen_flags: <defaults>
</compile_context>

<pallas_src>
from functools import partial

import jax
import jax.numpy as jnp
from jax import lax
from jax.experimental import pallas as pl
from jax.experimental.pallas import tpu as pltpu


def _pillar_kernel(start_ref, iw_ref, o_ref, *, n_atom, grating_dir, tile_r, size):
    # start_ref: SMEM int32 [n_atom] — per-atom interval start (pixels)
    # iw_ref:    SMEM int32 [n_atom] — per-atom interval width end-start (pixels)
    # o_ref:     VMEM float32 [tile_r, size] tile of the [size, size] output.
    if grating_dir == "x":
        # Line index == row index: mask varies only along sublanes. Compute a
        # lane-thin (tile_r, 1) strip; fold the block's row offset into the
        # scalar bound (scalar-unit sub) instead of adding it to a full iota.
        row0 = pl.program_id(0) * tile_r
        pos = lax.broadcasted_iota(jnp.int32, (tile_r, 1), 0)
        s0 = start_ref[0] - row0
        acc = (pos - s0).astype(jnp.uint32) < iw_ref[0].astype(jnp.uint32)
        for a in range(1, n_atom):  # n_atom is small & static -> unrolled
            s = start_ref[a] - row0
            acc = acc | ((pos - s).astype(jnp.uint32) < iw_ref[a].astype(jnp.uint32))
    else:  # 'y'
        # Line index == column index: identical for every row and grid step.
        # Compute a sublane-thin (1, size) strip once per block.
        pos = lax.broadcasted_iota(jnp.int32, (1, size), 1)
        acc = (pos - start_ref[0]).astype(jnp.uint32) < iw_ref[0].astype(jnp.uint32)
        for a in range(1, n_atom):
            acc = acc | (
                (pos - start_ref[a]).astype(jnp.uint32) < iw_ref[a].astype(jnp.uint32)
            )

    # Single lane-dense store of the broadcasted strip (HBM-write roofline).
    o_ref[...] = jnp.broadcast_to(acc.astype(jnp.float32), (tile_r, size))


def _choose_tile_r(size):
    """Largest 128-multiple divisor of `size` giving ~<=2 MiB f32 blocks while
    keeping >= 2 grid steps (so v7x can shard the 'parallel' axis across both
    TensorCores). Double-buffered blocks stay well under every generation's
    scoped-VMEM default."""
    if size <= 128:
        return size
    target_rows = max(128, (2 * 1024 * 1024) // (4 * size))
    best = 128
    cand = 256
    while cand <= size // 2:
        if size % cand == 0 and cand <= target_rows:
            best = cand
        cand += 128
    return best


def pillar_placer_forward(width, n_atom, period, region_size, grating_dir, n_lr, n_hr, res):
    """Equivalent of PillarPlacer().forward() for a given width vector."""
    del region_size, n_lr  # unused in the torch forward as well
    assert grating_dir in ("x", "y")
    assert n_atom >= 1
    size = n_hr[0] if grating_dir == "x" else n_hr[1]
    # TODO(synk): non-multiple-of-128 sizes would need a padded last block.
    assert size % 128 == 0, "size must be a multiple of 128"

    # Matches torch: (width*res).round().long(), ((arange+0.5)*period*res).round().long()
    atom_width_px = jnp.round(width * res).astype(jnp.int32)
    atom_centers = jnp.round(
        (jnp.arange(n_atom, dtype=width.dtype) + 0.5) * period * res
    ).astype(jnp.int32)
    start = atom_centers - atom_width_px // 2
    end = atom_centers + atom_width_px // 2
    interval_w = end - start  # pixel width of each atom's interval

    tile_r = _choose_tile_r(size)

    kernel = partial(
        _pillar_kernel,
        n_atom=n_atom,
        grating_dir=grating_dir,
        tile_r=tile_r,
        size=size,
    )
    return pl.pallas_call(
        kernel,
        out_shape=jax.ShapeDtypeStruct((size, size), jnp.float32),
        grid=(size // tile_r,),
        in_specs=[
            pl.BlockSpec(memory_space=pltpu.SMEM),  # start       [n_atom]
            pl.BlockSpec(memory_space=pltpu.SMEM),  # interval_w  [n_atom]
        ],
        out_specs=pl.BlockSpec((tile_r, size), lambda i: (i, 0)),
        compiler_params=pltpu.CompilerParams(dimension_semantics=("parallel",)),
        cost_estimate=pl.CostEstimate(
            flops=3 * n_atom * size,
            transcendentals=0,
            bytes_accessed=size * size * 4 + 2 * n_atom * 4,
        ),
    )(start, interval_w)


def _reference_forward(width, n_atom, period, grating_dir, n_hr, res):
    """Plain-JAX replica of the torch forward for correctness checking."""
    size = n_hr[0] if grating_dir == "x" else n_hr[1]
    atom_width_px = jnp.round(width * res).astype(jnp.int32)
    atom_centers = jnp.round(
        (jnp.arange(n_atom, dtype=width.dtype) + 0.5) * period * res
    ).astype(jnp.int32)
    positions = jnp.arange(size, dtype=jnp.int32)[None, :]
    start = (atom_centers - atom_width_px // 2)[:, None]
    end = (atom_centers + atom_width_px // 2)[:, None]
    mask = (positions >= start) & (positions < end)
    line_eps = jnp.any(mask, axis=0).astype(jnp.float32)
    if grating_dir == "y":
        return jnp.broadcast_to(line_eps[None, :], (n_hr[1], size))
    return jnp.broadcast_to(line_eps[:, None], (size, n_hr[0]))


if __name__ == "__main__":
    key = jax.random.PRNGKey(0)
    k1, k2 = jax.random.split(key)

    # Two deterministic synthetic configs consistent with the module's __init__
    # (second one exercises a multi-step grid: size=256 -> grid=(2,)).
    configs = [
        dict(n_atom=8, period=0.3, res=50, n_hr=(128, 128), n_lr=(64, 64), key=k1,
             wmin=0.08, wmax=0.22),
        dict(n_atom=12, period=0.4, res=50, n_hr=(256, 256), n_lr=(128, 128), key=k2,
             wmin=0.10, wmax=0.30),
    ]

    ok = True
    for cfg in configs:
        n_atom, period, res = cfg["n_atom"], cfg["period"], cfg["res"]
        n_hr, n_lr = cfg["n_hr"], cfg["n_lr"]
        region_size = (n_atom * period, n_atom * period)
        width = jax.random.uniform(
            cfg["key"], (n_atom,), dtype=jnp.float32,
            minval=cfg["wmin"], maxval=cfg["wmax"],
        )
        for grating_dir in ("x", "y"):
            eps = pillar_placer_forward(
                width, n_atom, period, region_size, grating_dir, n_lr, n_hr, res
            )
            eps = jax.block_until_ready(eps)
            ref = _reference_forward(width, n_atom, period, grating_dir, n_hr, res)
            size = n_hr[0] if grating_dir == "x" else n_hr[1]
            assert eps.shape == (size, size) and eps.dtype == jnp.float32
            ok = ok and bool(jnp.all(eps == ref))

    if ok:
        print("KERNEL_OK")
    else:
        print("KERNEL_MISMATCH")
</pallas_src>

<mosaic_0001>
module attributes {stable_mosaic.version = 11 : i64} {
  func.func @_pillar_kernel(%arg0: i32, %arg1: memref<8xi32, #tpu.memory_space<smem>>, %arg2: memref<8xi32, #tpu.memory_space<smem>>, %arg3: memref<128x128xf32, #tpu.memory_space<vmem>>) attributes {dimension_semantics = [#tpu.dimension_semantics<parallel>], iteration_bounds = array<i64: 1>, scalar_prefetch = 0 : i64, scratch_operands = 0 : i64, tpu.core_type = #tpu.core_type<tc>, window_params = [{transform_indices = @transform_0, window_bounds = array<i64: 8>}, {transform_indices = @transform_1, window_bounds = array<i64: 8>}, {transform_indices = @transform_2, window_bounds = array<i64: 128, 128>}]} {
    %c128_i32 = arith.constant 128 : i32
    %0 = arith.muli %arg0, %c128_i32 : i32
    %1 = tpu.iota {dimensions = array<i32: 0>} : vector<128x1xi32>
    %c0 = arith.constant 0 : index
    %2 = memref.load %arg1[%c0] : memref<8xi32, #tpu.memory_space<smem>>
    %3 = arith.subi %2, %0 : i32
    %4 = vector.broadcast %3 : i32 to vector<128x1xi32>
    %5 = arith.subi %1, %4 : vector<128x1xi32>
    %c0_0 = arith.constant 0 : index
    %6 = memref.load %arg2[%c0_0] : memref<8xi32, #tpu.memory_space<smem>>
    %7 = vector.broadcast %6 : i32 to vector<128x1xi32>
    %8 = arith.cmpi ult, %5, %7 : vector<128x1xi32>
    %c1 = arith.constant 1 : index
    %9 = memref.load %arg1[%c1] : memref<8xi32, #tpu.memory_space<smem>>
    %10 = arith.subi %9, %0 : i32
    %11 = vector.broadcast %10 : i32 to vector<128x1xi32>
    %12 = arith.subi %1, %11 : vector<128x1xi32>
    %c1_1 = arith.constant 1 : index
    %13 = memref.load %arg2[%c1_1] : memref<8xi32, #tpu.memory_space<smem>>
    %14 = vector.broadcast %13 : i32 to vector<128x1xi32>
    %15 = arith.cmpi ult, %12, %14 : vector<128x1xi32>
    %16 = arith.ori %8, %15 : vector<128x1xi1>
    %c2 = arith.constant 2 : index
    %17 = memref.load %arg1[%c2] : memref<8xi32, #tpu.memory_space<smem>>
    %18 = arith.subi %17, %0 : i32
    %19 = vector.broadcast %18 : i32 to vector<128x1xi32>
    %20 = arith.subi %1, %19 : vector<128x1xi32>
    %c2_2 = arith.constant 2 : index
    %21 = memref.load %arg2[%c2_2] : memref<8xi32, #tpu.memory_space<smem>>
    %22 = vector.broadcast %21 : i32 to vector<128x1xi32>
    %23 = arith.cmpi ult, %20, %22 : vector<128x1xi32>
    %24 = arith.ori %16, %23 : vector<128x1xi1>
    %c3 = arith.constant 3 : index
    %25 = memref.load %arg1[%c3] : memref<8xi32, #tpu.memory_space<smem>>
    %26 = arith.subi %25, %0 : i32
    %27 = vector.broadcast %26 : i32 to vector<128x1xi32>
    %28 = arith.subi %1, %27 : vector<128x1xi32>
    %c3_3 = arith.constant 3 : index
    %29 = memref.load %arg2[%c3_3] : memref<8xi32, #tpu.memory_space<smem>>
    %30 = vector.broadcast %29 : i32 to vector<128x1xi32>
    %31 = arith.cmpi ult, %28, %30 : vector<128x1xi32>
    %32 = arith.ori %24, %31 : vector<128x1xi1>
    %c4 = arith.constant 4 : index
    %33 = memref.load %arg1[%c4] : memref<8xi32, #tpu.memory_space<smem>>
    %34 = arith.subi %33, %0 : i32
    %35 = vector.broadcast %34 : i32 to vector<128x1xi32>
    %36 = arith.subi %1, %35 : vector<128x1xi32>
    %c4_4 = arith.constant 4 : index
    %37 = memref.load %arg2[%c4_4] : memref<8xi32, #tpu.memory_space<smem>>
    %38 = vector.broadcast %37 : i32 to vector<128x1xi32>
    %39 = arith.cmpi ult, %36, %38 : vector<128x1xi32>
    %40 = arith.ori %32, %39 : vector<128x1xi1>
    %c5 = arith.constant 5 : index
    %41 = memref.load %arg1[%c5] : memref<8xi32, #tpu.memory_space<smem>>
    %42 = arith.subi %41, %0 : i32
    %43 = vector.broadcast %42 : i32 to vector<128x1xi32>
    %44 = arith.subi %1, %43 : vector<128x1xi32>
    %c5_5 = arith.constant 5 : index
    %45 = memref.load %arg2[%c5_5] : memref<8xi32, #tpu.memory_space<smem>>
    %46 = vector.broadcast %45 : i32 to vector<128x1xi32>
    %47 = arith.cmpi ult, %44, %46 : vector<128x1xi32>
    %48 = arith.ori %40, %47 : vector<128x1xi1>
    %c6 = arith.constant 6 : index
    %49 = memref.load %arg1[%c6] : memref<8xi32, #tpu.memory_space<smem>>
    %50 = arith.subi %49, %0 : i32
    %51 = vector.broadcast %50 : i32 to vector<128x1xi32>
    %52 = arith.subi %1, %51 : vector<128x1xi32>
    %c6_6 = arith.constant 6 : index
    %53 = memref.load %arg2[%c6_6] : memref<8xi32, #tpu.memory_space<smem>>
    %54 = vector.broadcast %53 : i32 to vector<128x1xi32>
    %55 = arith.cmpi ult, %52, %54 : vector<128x1xi32>
    %56 = arith.ori %48, %55 : vector<128x1xi1>
    %c7 = arith.constant 7 : index
    %57 = memref.load %arg1[%c7] : memref<8xi32, #tpu.memory_space<smem>>
    %58 = arith.subi %57, %0 : i32
    %59 = vector.broadcast %58 : i32 to vector<128x1xi32>
    %60 = arith.subi %1, %59 : vector<128x1xi32>
    %c7_7 = arith.constant 7 : index
    %61 = memref.load %arg2[%c7_7] : memref<8xi32, #tpu.memory_space<smem>>
    %62 = vector.broadcast %61 : i32 to vector<128x1xi32>
    %63 = arith.cmpi ult, %60, %62 : vector<128x1xi32>
    %64 = arith.ori %56, %63 : vector<128x1xi1>
    %65 = arith.extui %64 : vector<128x1xi1> to vector<128x1xi32>
    %66 = arith.sitofp %65 : vector<128x1xi32> to vector<128x1xf32>
    %67 = vector.shape_cast %66 : vector<128x1xf32> to vector<128x1xf32>
    %68 = vector.broadcast %67 : vector<128x1xf32> to vector<128x128xf32>
    %c0_8 = arith.constant 0 : index
    %c0_9 = arith.constant 0 : index
    %69 = vector.load %arg3[%c0_8, %c0_9] : memref<128x128xf32, #tpu.memory_space<vmem>>, vector<128x128xf32>
    tpu.vector_store %arg3[%c0_8, %c0_9], %68 {strides = array<i32>} : memref<128x128xf32, #tpu.memory_space<vmem>>, vector<128x128xf32>,
    return
  }
  func.func @transform_0(%arg0: i32) -> i32 {
    %c0_i32 = arith.constant 0 : i32
    %c0_i32_0 = arith.constant 0 : i32
    return %c0_i32 : i32
  }
  func.func @transform_1(%arg0: i32) -> i32 {
    %c0_i32 = arith.constant 0 : i32
    %c0_i32_0 = arith.constant 0 : i32
    return %c0_i32 : i32
  }
  func.func @transform_2(%arg0: i32) -> (i32, i32) {
    %c0_i32 = arith.constant 0 : i32
    %c0_i32_0 = arith.constant 0 : i32
    return %arg0, %c0_i32 : i32, i32
  }
}

</mosaic_0001>

<bundles_post_ra>
// kernel: tpu_custom_call.1
= control target key start
LH: loop header
LB: loop body
LE: loop exit
PB: predicated region body
PF: predicated region fallthrough
CT: control target
= control target key end

     0   :  { %7 = vsyncpa [#allocation4], 0  ;;  %s1735_s0 = inlined_call_operand.hbm [shape: s32[8], index: 0, kind: input, shape index: {}]   ;;  %s1736_s1 = inlined_call_operand.hbm [shape: s32[8], index: 1, kind: input, shape index: {}]   ;;  %s1737_s2 = inlined_call_operand.hbm [shape: f32[128,128], index: 2, kind: output, shape index: {}]  }
   0x1   :  { %8 = vsyncpa [#allocation6], 0 }
   0x2   :  { %9 = vsyncpa [#allocation3], 0  ;;  %s15_s11 = sshll.u32 %s1735_s0, 4  ;;  %s24_s14 = sshll.u32 %s1736_s1, 4  ;;  %s16_s11 = int_to_ptr.hbm [resolvable:$true] %s15_s11  ;;  %s25_s14 = int_to_ptr.hbm [resolvable:$true] %s24_s14 }
   0x3   :  { %s1133_s15 = smov [#allocation2]   ;;  %s1134_s16 = smov [#allocation5]  }
   0x4   :  { %18 = dma.hbm_to_smem %s16_s11, 16, %s1133_s15, [#allocation4]  }
   0x5   :  { %27 = dma.hbm_to_smem %s25_s14, 16, %s1134_s16, [#allocation6]  }
   0x6   :  { %1127 = dma.done.wait [#allocation4], 16  }
   0x7   :  { %1128 = vsyncadd [#allocation4], 4294967280 }
   0x8   :  { %1129 = dma.done.wait [#allocation6], 16  }
   0x9   :  { %1130 = vsyncadd [#allocation6], 4294967280 }
   0xa   :  { %36 = sfence }
   0xb   :  { %v38_v0 = vlaneseq  ;;  %s55_s17 = sld [smem:[#allocation2]]  ;;  %s1136_s3 = smov [#allocation7]  }
   0xc   :  { %s74_s18 = sld [smem:[#allocation5]]  ;;  %s771_s4 = sshll.u32 %s1136_s3, 4  ;;  %s772_s4 = int_to_ptr.vmem [resolvable:$true] %s771_s4 }
   0xd   :  { %v1160_v1 = vshrl.u32 %v38_v0, 7  ;;  %s819_s0 = sld [smem:[#allocation2 + $0x1]]  ;;  %s773_s7 = sshll.u32 %s1737_s2, 4  ;;  %s774_s7 = int_to_ptr.hbm [resolvable:$true] %s773_s7 }
   0xe   :  { %s820_s19 = sld [smem:[#allocation5 + $0x1]]  ;;  %s1137_s8 = smov 128  }
   0xf   :  { %s853_s20 = sld [smem:[#allocation2 + $0x2]]  ;;  %v1163_v2 = vadd.s32 8, %v1160_v1  ;;  %v1166_v3 = vadd.s32 16, %v1160_v1  ;;  %v1169_v4 = vadd.s32 24, %v1160_v1  ;;  %v1172_v5 = vadd.s32 32, %v1160_v1  ;;  %s1138_s9 = smov 8  }
  0x10   :  { %s854_s1 = sld [smem:[#allocation5 + $0x2]]  ;;  %v1177_v7 = vadd.s32 40, %v1160_v1 }
  0x11   :  { %v1174_v6 = vstv %s55_s17  ;;  %s887_s21 = sld [smem:[#allocation2 + $0x3]] }
  0x12   :  { %v58_v8 = vsub.s32 %v1160_v1, %v1174_v6  ;;  %v75_v9 = vstv %s74_s18  ;;  %s1181_s22 = sld [smem:[#allocation5 + $0x3]]  ;;  %v59_v10 = vsub.s32 %v1163_v2, %v1174_v6  ;;  %v60_v11 = vsub.s32 %v1166_v3, %v1174_v6 }
  0x13   :  { %v1187_v12 = vxor.u32 2147483648, %v75_v9  ;;  %v1189_v13 = vstv %s819_s0  ;;  %s921_s23 = sld [smem:[#allocation2 + $0x4]]  ;;  %v61_v14 = vsub.s32 %v1169_v4, %v1174_v6  ;;  %v62_v15 = vsub.s32 %v1172_v5, %v1174_v6 }
  0x14   :  { %v787_v16 = vxor.u32 2147483648, %v58_v8  ;;  %v127_v17 = vsub.s32 %v1160_v1, %v1189_v13  ;;  %v144_v18 = vstv %s820_s19  ;;  %s1197_s24 = sld [smem:[#allocation5 + $0x4]]  ;;  %v789_v19 = vxor.u32 2147483648, %v59_v10 }
  0x15   :  { %v1199_v20 = vxor.u32 2147483648, %v144_v18  ;;  %v1201_v21 = vstv %s853_s20  ;;  %s1203_s25 = sld [smem:[#allocation2 + $0x5]]  ;;  %v128_v22 = vsub.s32 %v1163_v2, %v1189_v13  ;;  %v1207_v23 = vxor.u32 2147483648, %v60_v11 }
  0x16   :  { %vm78_vm0 = vcmp.lt.s32.totalorder %v787_v16, %v1187_v12  ;;  %v821_v24 = vxor.u32 2147483648, %v127_v17  ;;  %v212_v25 = vsub.s32 %v1160_v1, %v1201_v21  ;;  %v229_v26 = vstv %s854_s1  ;;  %s1212_s26 = sld [smem:[#allocation5 + $0x5]] }
  0x17   :  { %v1214_v27 = vxor.u32 2147483648, %v229_v26  ;;  %v1216_v28 = vstv %s887_s21  ;;  %s1218_s27 = sld [smem:[#allocation2 + $0x6]]  ;;  %vm81_vm1 = vcmp.lt.s32.totalorder %v789_v19, %v1187_v12  ;;  %v823_v29 = vxor.u32 2147483648, %v128_v22 }
  0x18   :  { %vm147_vm2 = vcmp.lt.s32.totalorder %v821_v24, %v1199_v20  ;;  %v855_v30 = vxor.u32 2147483648, %v212_v25  ;;  %v297_v31 = vsub.s32 %v1160_v1, %v1216_v28  ;;  %v314_v32 = vstv %s1181_s22  ;;  %s1225_s28 = sld [smem:[#allocation5 + $0x6]] }
  0x19   :  { %vm193_vm3 = vmor %vm78_vm0, %vm147_vm2  ;;  %v1229_v33 = vxor.u32 2147483648, %v314_v32  ;;  %v1231_v34 = vstv %s921_s23  ;;  %s1023_s29 = sld [smem:[#allocation2 + $0x7]]  ;;  %vm150_vm4 = vcmp.lt.s32.totalorder %v823_v29, %v1199_v20  ;;  %v213_v35 = vsub.s32 %v1163_v2, %v1201_v21 }
  0x1a   :  { %vm232_vm5 = vcmp.lt.s32.totalorder %v855_v30, %v1214_v27  ;;  %v889_v36 = vxor.u32 2147483648, %v297_v31  ;;  %v382_v37 = vsub.s32 %v1160_v1, %v1231_v34  ;;  %v399_v38 = vstv %s1197_s24  ;;  %s1240_s30 = sld [smem:[#allocation5 + $0x7]]  ;;  %vm1244_vm6 = vmor %vm81_vm1, %vm150_vm4 }
  0x1b   :  { %vm278_vm7 = vmor %vm193_vm3, %vm232_vm5  ;;  %v1248_v40 = vxor.u32 2147483648, %v399_v38  ;;  %v1251_v41 = vstv %s1203_s25  ;;  %v857_v42 = vxor.u32 2147483648, %v213_v35  ;;  %v298_v43 = vsub.s32 %v1163_v2, %v1216_v28 }
  0x1c   :  { %vm317_vm8 = vcmp.lt.s32.totalorder %v889_v36, %v1229_v33  ;;  %v923_v44 = vxor.u32 2147483648, %v382_v37  ;;  %v467_v45 = vsub.s32 %v1160_v1, %v1251_v41  ;;  %v484_v46 = vstv %s1212_s26 }
  0x1d   :  { %vm363_vm9 = vmor %vm278_vm7, %vm317_vm8  ;;  %v1259_v47 = vxor.u32 2147483648, %v484_v46  ;;  %v1262_v48 = vstv %s1218_s27  ;;  %vm235_vm10 = vcmp.lt.s32.totalorder %v857_v42, %v1214_v27  ;;  %v891_v49 = vxor.u32 2147483648, %v298_v43 }
  0x1e   :  { %vm402_vm11 = vcmp.lt.s32.totalorder %v923_v44, %v1248_v40  ;;  %v957_v50 = vxor.u32 2147483648, %v467_v45  ;;  %v552_v51 = vsub.s32 %v1160_v1, %v1262_v48  ;;  %v569_v52 = vstv %s1225_s28  ;;  %vm279_vm12 = vmor %vm1244_vm6, %vm235_vm10 }
  0x1f   :  { %vm448_vm13 = vmor %vm363_vm9, %vm402_vm11  ;;  %v1271_v53 = vxor.u32 2147483648, %v569_v52  ;;  %v1273_v54 = vstv %s1023_s29  ;;  %vm320_vm14 = vcmp.lt.s32.totalorder %v891_v49, %v1229_v33  ;;  %v383_v55 = vsub.s32 %v1163_v2, %v1231_v34 }
  0x20   :  { %vm487_vm15 = vcmp.lt.s32.totalorder %v957_v50, %v1259_v47  ;;  %v991_v56 = vxor.u32 2147483648, %v552_v51  ;;  %v637_v57 = vsub.s32 %v1160_v1, %v1273_v54  ;;  %v654_v58 = vstv %s1240_s30  ;;  %vm1282_vm0 = vmor %vm279_vm12, %vm320_vm14 }
  0x21   :  { %vm533_vm1 = vmor %vm448_vm13, %vm487_vm15  ;;  %v1286_v60 = vxor.u32 2147483648, %v654_v58  ;;  %v925_v61 = vxor.u32 2147483648, %v383_v55  ;;  %v468_v62 = vsub.s32 %v1163_v2, %v1251_v41  ;;  %v553_v63 = vsub.s32 %v1163_v2, %v1262_v48 }
  0x22   :  { %vm572_vm2 = vcmp.lt.s32.totalorder %v991_v56, %v1271_v53  ;;  %v1025_v0 = vxor.u32 2147483648, %v637_v57  ;;  %v638_v8 = vsub.s32 %v1163_v2, %v1273_v54  ;;  %vm84_vm3 = vcmp.lt.s32.totalorder %v1207_v23, %v1187_v12 }
  0x23   :  { %vm618_vm4 = vmor %vm533_vm1, %vm572_vm2  ;;  %vm405_vm5 = vcmp.lt.s32.totalorder %v925_v61, %v1248_v40  ;;  %v959_v9 = vxor.u32 2147483648, %v468_v62  ;;  %v993_v10 = vxor.u32 2147483648, %v553_v63  ;;  %v129_v11 = vsub.s32 %v1166_v3, %v1189_v13 }
  0x24   :  { %vm657_vm6 = vcmp.lt.s32.totalorder %v1025_v0, %v1286_v60  ;;  %vm449_vm7 = vmor %vm1282_vm0, %vm405_vm5  ;;  %v1027_v16 = vxor.u32 2147483648, %v638_v8  ;;  %v214_v2 = vsub.s32 %v1166_v3, %v1201_v21  ;;  %v299_v17 = vsub.s32 %v1166_v3, %v1216_v28 }
  0x25   :  { %vm703_vm8 = vmor %vm618_vm4, %vm657_vm6  ;;  %vm490_vm9 = vcmp.lt.s32.totalorder %v959_v9, %v1259_v47  ;;  %vm575_vm10 = vcmp.lt.s32.totalorder %v993_v10, %v1271_v53  ;;  %v825_v18 = vxor.u32 2147483648, %v129_v11  ;;  %v384_v19 = vsub.s32 %v1166_v3, %v1231_v34 }
  0x26   :  { %v1135_v22 = vmov 0.0   ;;  %vm534_vm11 = vmor %vm449_vm7, %vm490_vm9  ;;  %vm660_vm12 = vcmp.lt.s32.totalorder %v1027_v16, %v1286_v60  ;;  %v859_v25 = vxor.u32 2147483648, %v214_v2  ;;  %v893_v26 = vxor.u32 2147483648, %v299_v17 }
  0x27   :  { %v1057_v24 = vsel %vm703_vm8, 1.0, %v1135_v22  ;;  %vm619_vm13 = vmor %vm534_vm11, %vm575_vm10  ;;  %vm153_vm14 = vcmp.lt.s32.totalorder %v825_v18, %v1199_v20  ;;  %v927_v29 = vxor.u32 2147483648, %v384_v19  ;;  %v469_v30 = vsub.s32 %v1166_v3, %v1251_v41 }
  0x28   :  { %751 = vst [vmem:[#allocation7] sm:$0xff] %v1057_v24  ;;  %v554_v31 = vsub.s32 %v1166_v3, %v1262_v48  ;;  %vm704_vm15 = vmor %vm619_vm13, %vm660_vm12  ;;  %vm238_vm0 = vcmp.lt.s32.totalorder %v859_v25, %v1214_v27  ;;  %vm323_vm1 = vcmp.lt.s32.totalorder %v893_v26, %v1229_v33  ;;  %v639_v32 = vsub.s32 %v1166_v3, %v1273_v54 }
  0x29   :  { %v793_v35 = vxor.u32 2147483648, %v61_v14  ;;  %v1058_v36 = vsel %vm704_vm15, 1.0, %v1135_v22  ;;  %vm195_vm2 = vmor %vm84_vm3, %vm153_vm14  ;;  %vm408_vm4 = vcmp.lt.s32.totalorder %v927_v29, %v1248_v40  ;;  %v961_v37 = vxor.u32 2147483648, %v469_v30 }
  0x2a   :  { %v995_v38 = vxor.u32 2147483648, %v554_v31  ;;  %752 = vst [vmem:[#allocation7 + $0x8] sm:$0xff] %v1058_v36  ;;  %vm280_vm5 = vmor %vm195_vm2, %vm238_vm0  ;;  %v1029_v39 = vxor.u32 2147483648, %v639_v32  ;;  %v130_v3 = vsub.s32 %v1169_v4, %v1189_v13  ;;  %v215_v14 = vsub.s32 %v1169_v4, %v1201_v21 }
  0x2b   :  { %vm87_vm6 = vcmp.lt.s32.totalorder %v793_v35, %v1187_v12  ;;  %vm365_vm7 = vmor %vm280_vm5, %vm323_vm1  ;;  %vm493_vm8 = vcmp.lt.s32.totalorder %v961_v37, %v1259_v47  ;;  %v300_v23 = vsub.s32 %v1169_v4, %v1216_v28  ;;  %v385_v42 = vsub.s32 %v1169_v4, %v1231_v34 }
  0x2c   :  { %vm578_vm3 = vcmp.lt.s32.totalorder %v995_v38, %v1271_v53  ;;  %vm450_vm9 = vmor %vm365_vm7, %vm408_vm4  ;;  %vm663_vm10 = vcmp.lt.s32.totalorder %v1029_v39, %v1286_v60  ;;  %v827_v43 = vxor.u32 2147483648, %v130_v3  ;;  %v861_v44 = vxor.u32 2147483648, %v215_v14 }
  0x2d   :  { %v470_v45 = vsub.s32 %v1169_v4, %v1251_v41  ;;  %vm535_vm11 = vmor %vm450_vm9, %vm493_vm8  ;;  %v895_v46 = vxor.u32 2147483648, %v300_v23  ;;  %v929_v49 = vxor.u32 2147483648, %v385_v42  ;;  %v555_v50 = vsub.s32 %v1169_v4, %v1262_v48 }
  0x2e   :  { %v640_v51 = vsub.s32 %v1169_v4, %v1273_v54  ;;  %vm620_vm12 = vmor %vm535_vm11, %vm578_vm3  ;;  %vm156_vm13 = vcmp.lt.s32.totalorder %v827_v43, %v1199_v20  ;;  %vm241_vm14 = vcmp.lt.s32.totalorder %v861_v44, %v1214_v27  ;;  %v795_v55 = vxor.u32 2147483648, %v62_v15 }
  0x2f   :  { %v963_v52 = vxor.u32 2147483648, %v470_v45  ;;  %vm705_vm15 = vmor %vm620_vm12, %vm663_vm10  ;;  %vm326_vm0 = vcmp.lt.s32.totalorder %v895_v46, %v1229_v33  ;;  %vm411_vm1 = vcmp.lt.s32.totalorder %v929_v49, %v1248_v40  ;;  %v997_v56 = vxor.u32 2147483648, %v555_v50 }
  0x30   :  { %v1031_v57 = vxor.u32 2147483648, %v640_v51  ;;  %v1059_v58 = vsel %vm705_vm15, 1.0, %v1135_v22  ;;  %vm196_vm2 = vmor %vm87_vm6, %vm156_vm13  ;;  %vm90_vm5 = vcmp.lt.s32.totalorder %v795_v55, %v1187_v12  ;;  %v131_v4 = vsub.s32 %v1172_v5, %v1189_v13 }
  0x31   :  { %vm496_vm4 = vcmp.lt.s32.totalorder %v963_v52, %v1259_v47  ;;  %753 = vst [vmem:[#allocation7 + $0x10] sm:$0xff] %v1059_v58  ;;  %vm281_vm7 = vmor %vm196_vm2, %vm241_vm14  ;;  %vm581_vm8 = vcmp.lt.s32.totalorder %v997_v56, %v1271_v53  ;;  %v216_v15 = vsub.s32 %v1172_v5, %v1201_v21  ;;  %v301_v59 = vsub.s32 %v1172_v5, %v1216_v28 }
  0x32   :  { %vm666_vm3 = vcmp.lt.s32.totalorder %v1031_v57, %v1286_v60  ;;  %vm366_vm6 = vmor %vm281_vm7, %vm326_vm0  ;;  %v829_v61 = vxor.u32 2147483648, %v131_v4  ;;  %v386_v62 = vsub.s32 %v1172_v5, %v1231_v34  ;;  %v471_v63 = vsub.s32 %v1172_v5, %v1251_v41 }
  0x33   :  { %v556_v0 = vsub.s32 %v1172_v5, %v1262_v48  ;;  %vm451_vm9 = vmor %vm366_vm6, %vm411_vm1  ;;  %v863_v8 = vxor.u32 2147483648, %v216_v15  ;;  %v897_v9 = vxor.u32 2147483648, %v301_v59  ;;  %v641_v10 = vsub.s32 %v1172_v5, %v1273_v54 }
  0x34   :  { %v63_v11 = vsub.s32 %v1177_v7, %v1174_v6  ;;  %vm536_vm10 = vmor %vm451_vm9, %vm496_vm4  ;;  %vm159_vm11 = vcmp.lt.s32.totalorder %v829_v61, %v1199_v20  ;;  %v931_v16 = vxor.u32 2147483648, %v386_v62  ;;  %v965_v2 = vxor.u32 2147483648, %v471_v63 }
  0x35   :  { %v999_v17 = vxor.u32 2147483648, %v556_v0  ;;  %vm621_vm12 = vmor %vm536_vm10, %vm581_vm8  ;;  %vm244_vm13 = vcmp.lt.s32.totalorder %v863_v8, %v1214_v27  ;;  %vm329_vm14 = vcmp.lt.s32.totalorder %v897_v9, %v1229_v33  ;;  %v1033_v5 = vxor.u32 2147483648, %v641_v10 }
  0x36   :  { %vm706_vm15 = vmor %vm621_vm12, %vm666_vm3  ;;  %vm414_vm0 = vcmp.lt.s32.totalorder %v931_v16, %v1248_v40  ;;  %v797_v18 = vxor.u32 2147483648, %v63_v11  ;;  %v132_v19 = vsub.s32 %v1177_v7, %v1189_v13  ;;  %vm499_vm2 = vcmp.lt.s32.totalorder %v965_v2, %v1259_v47 }
  0x37   :  { %v1060_v24 = vsel %vm706_vm15, 1.0, %v1135_v22  ;;  %vm197_vm1 = vmor %vm90_vm5, %vm159_vm11  ;;  %vm584_vm4 = vcmp.lt.s32.totalorder %v999_v17, %v1271_v53  ;;  %v217_v25 = vsub.s32 %v1177_v7, %v1201_v21  ;;  %v302_v29 = vsub.s32 %v1177_v7, %v1216_v28 }
  0x38   :  { %754 = vst [vmem:[#allocation7 + $0x18] sm:$0xff] %v1060_v24  ;;  %vm282_vm7 = vmor %vm197_vm1, %vm244_vm13  ;;  %v831_v26 = vxor.u32 2147483648, %v132_v19  ;;  %v387_v30 = vsub.s32 %v1177_v7, %v1231_v34  ;;  %v472_v31 = vsub.s32 %v1177_v7, %v1251_v41  ;;  %v557_v35 = vsub.s32 %v1177_v7, %v1262_v48 }
  0x39   :  { %vm367_vm5 = vmor %vm282_vm7, %vm329_vm14  ;;  %v865_v32 = vxor.u32 2147483648, %v217_v25  ;;  %v642_v36 = vsub.s32 %v1177_v7, %v1273_v54  ;;  %v45_v37 = vadd.s32 48, %v1160_v1  ;;  %vm669_vm3 = vcmp.lt.s32.totalorder %v1033_v5, %v1286_v60 }
  0x3a   :  { %vm452_vm8 = vmor %vm367_vm5, %vm414_vm0  ;;  %v899_v38 = vxor.u32 2147483648, %v302_v29  ;;  %v933_v39 = vxor.u32 2147483648, %v387_v30  ;;  %v967_v3 = vxor.u32 2147483648, %v472_v31  ;;  %vm93_vm9 = vcmp.lt.s32.totalorder %v797_v18, %v1187_v12 }
  0x3b   :  { %vm537_vm6 = vmor %vm452_vm8, %vm499_vm2  ;;  %vm162_vm10 = vcmp.lt.s32.totalorder %v831_v26, %v1199_v20  ;;  %v1001_v14 = vxor.u32 2147483648, %v557_v35  ;;  %v64_v7 = vsub.s32 %v45_v37, %v1174_v6  ;;  %vm247_vm12 = vcmp.lt.s32.totalorder %v865_v32, %v1214_v27 }
  0x3c   :  { %vm622_vm11 = vmor %vm537_vm6, %vm584_vm4  ;;  %vm332_vm13 = vcmp.lt.s32.totalorder %v899_v38, %v1229_v33  ;;  %v1035_v23 = vxor.u32 2147483648, %v642_v36  ;;  %v133_v42 = vsub.s32 %v45_v37, %v1189_v13  ;;  %vm417_vm15 = vcmp.lt.s32.totalorder %v933_v39, %v1248_v40 }
  0x3d   :  { %vm707_vm14 = vmor %vm622_vm11, %vm669_vm3  ;;  %vm502_vm0 = vcmp.lt.s32.totalorder %v967_v3, %v1259_v47  ;;  %v799_v43 = vxor.u32 2147483648, %v64_v7  ;;  %v218_v44 = vsub.s32 %v45_v37, %v1201_v21  ;;  %v303_v49 = vsub.s32 %v45_v37, %v1216_v28 }
  0x3e   :  { %v1061_v45 = vsel %vm707_vm14, 1.0, %v1135_v22  ;;  %vm198_vm1 = vmor %vm93_vm9, %vm162_vm10  ;;  %v833_v46 = vxor.u32 2147483648, %v133_v42  ;;  %v388_v50 = vsub.s32 %v45_v37, %v1231_v34  ;;  %vm587_vm4 = vcmp.lt.s32.totalorder %v1001_v14, %v1271_v53 }
  0x3f   :  { %755 = vst [vmem:[#allocation7 + $0x20] sm:$0xff] %v1061_v45  ;;  %vm283_vm2 = vmor %vm198_vm1, %vm247_vm12  ;;  %v867_v51 = vxor.u32 2147483648, %v218_v44  ;;  %v473_v52 = vsub.s32 %v45_v37, %v1251_v41  ;;  %v558_v55 = vsub.s32 %v45_v37, %v1262_v48  ;;  %vm672_vm5 = vcmp.lt.s32.totalorder %v1035_v23, %v1286_v60 }
  0x40   :  { %vm368_vm7 = vmor %vm283_vm2, %vm332_vm13  ;;  %v901_v56 = vxor.u32 2147483648, %v303_v49  ;;  %v935_v57 = vxor.u32 2147483648, %v388_v50  ;;  %v643_v58 = vsub.s32 %v45_v37, %v1273_v54  ;;  %vm96_vm3 = vcmp.lt.s32.totalorder %v799_v43, %v1187_v12 }
  0x41   :  { %vm453_vm8 = vmor %vm368_vm7, %vm417_vm15  ;;  %vm165_vm6 = vcmp.lt.s32.totalorder %v833_v46, %v1199_v20  ;;  %v969_v4 = vxor.u32 2147483648, %v473_v52  ;;  %v46_v15 = vadd.s32 56, %v1160_v1  ;;  %vm250_vm10 = vcmp.lt.s32.totalorder %v867_v51, %v1214_v27 }
  0x42   :  { %vm538_vm9 = vmor %vm453_vm8, %vm502_vm0  ;;  %vm335_vm11 = vcmp.lt.s32.totalorder %v901_v56, %v1229_v33  ;;  %vm420_vm12 = vcmp.lt.s32.totalorder %v935_v57, %v1248_v40  ;;  %v1003_v59 = vxor.u32 2147483648, %v558_v55  ;;  %v1037_v61 = vxor.u32 2147483648, %v643_v58 }
  0x43   :  { %vm623_vm13 = vmor %vm538_vm9, %vm587_vm4  ;;  %v65_v62 = vsub.s32 %v46_v15, %v1174_v6  ;;  %v134_v63 = vsub.s32 %v46_v15, %v1189_v13  ;;  %v1459_v0 = vadd.s32 64, %v1160_v1  ;;  %vm505_vm15 = vcmp.lt.s32.totalorder %v969_v4, %v1259_v47 }
  0x44   :  { %vm708_vm14 = vmor %vm623_vm13, %vm672_vm5  ;;  %v219_v8 = vsub.s32 %v46_v15, %v1201_v21  ;;  %v304_v9 = vsub.s32 %v46_v15, %v1216_v28  ;;  %v389_v10 = vsub.s32 %v46_v15, %v1231_v34  ;;  %v474_v17 = vsub.s32 %v46_v15, %v1251_v41 }
  0x45   :  { %v1062_v11 = vsel %vm708_vm14, 1.0, %v1135_v22  ;;  %vm199_vm0 = vmor %vm96_vm3, %vm165_vm6  ;;  %v801_v16 = vxor.u32 2147483648, %v65_v62  ;;  %v835_v2 = vxor.u32 2147483648, %v134_v63  ;;  %v559_v24 = vsub.s32 %v46_v15, %v1262_v48 }
  0x46   :  { %756 = vst [vmem:[#allocation7 + $0x28] sm:$0xff] %v1062_v11  ;;  %vm284_vm1 = vmor %vm199_vm0, %vm250_vm10  ;;  %v869_v5 = vxor.u32 2147483648, %v219_v8  ;;  %v903_v18 = vxor.u32 2147483648, %v304_v9  ;;  %v937_v19 = vxor.u32 2147483648, %v389_v10  ;;  %vm590_vm4 = vcmp.lt.s32.totalorder %v1003_v59, %v1271_v53 }
  0x47   :  { %vm369_vm2 = vmor %vm284_vm1, %vm335_vm11  ;;  %vm675_vm7 = vcmp.lt.s32.totalorder %v1037_v61, %v1286_v60  ;;  %v644_v25 = vsub.s32 %v46_v15, %v1273_v54  ;;  %vm99_vm8 = vcmp.lt.s32.totalorder %v801_v16, %v1187_v12  ;;  %vm168_vm3 = vcmp.lt.s32.totalorder %v835_v2, %v1199_v20 }
  0x48   :  { %vm454_vm5 = vmor %vm369_vm2, %vm420_vm12  ;;  %vm253_vm6 = vcmp.lt.s32.totalorder %v869_v5, %v1214_v27  ;;  %v971_v26 = vxor.u32 2147483648, %v474_v17  ;;  %vm338_vm10 = vcmp.lt.s32.totalorder %v903_v18, %v1229_v33  ;;  %vm423_vm11 = vcmp.lt.s32.totalorder %v937_v19, %v1248_v40 }
  0x49   :  { %vm539_vm9 = vmor %vm454_vm5, %vm505_vm15  ;;  %v66_v29 = vsub.s32 %v1459_v0, %v1174_v6  ;;  %v135_v30 = vsub.s32 %v1459_v0, %v1189_v13  ;;  %v1005_v31 = vxor.u32 2147483648, %v559_v24  ;;  %v220_v32 = vsub.s32 %v1459_v0, %v1201_v21 }
  0x4a   :  { %vm624_vm12 = vmor %vm539_vm9, %vm590_vm4  ;;  %v305_v35 = vsub.s32 %v1459_v0, %v1216_v28  ;;  %v390_v36 = vsub.s32 %v1459_v0, %v1231_v34  ;;  %v1039_v37 = vxor.u32 2147483648, %v644_v25  ;;  %v475_v3 = vsub.s32 %v1459_v0, %v1251_v41 }
  0x4b   :  { %vm709_vm13 = vmor %vm624_vm12, %vm675_vm7  ;;  %v803_v38 = vxor.u32 2147483648, %v66_v29  ;;  %v837_v39 = vxor.u32 2147483648, %v135_v30  ;;  %v871_v7 = vxor.u32 2147483648, %v220_v32  ;;  %vm508_vm0 = vcmp.lt.s32.totalorder %v971_v26, %v1259_v47 }
  0x4c   :  { %v1063_v14 = vsel %vm709_vm13, 1.0, %v1135_v22  ;;  %vm200_vm14 = vmor %vm99_vm8, %vm168_vm3  ;;  %v905_v23 = vxor.u32 2147483648, %v305_v35  ;;  %v939_v42 = vxor.u32 2147483648, %v390_v36  ;;  %v560_v43 = vsub.s32 %v1459_v0, %v1262_v48 }
  0x4d   :  { %757 = vst [vmem:[#allocation7 + $0x30] sm:$0xff] %v1063_v14  ;;  %vm285_vm15 = vmor %vm200_vm14, %vm253_vm6  ;;  %vm593_vm2 = vcmp.lt.s32.totalorder %v1005_v31, %v1271_v53  ;;  %v645_v44 = vsub.s32 %v1459_v0, %v1273_v54  ;;  %vm678_vm7 = vcmp.lt.s32.totalorder %v1039_v37, %v1286_v60  ;;  %vm102_vm5 = vcmp.lt.s32.totalorder %v803_v38, %v1187_v12 }
  0x4e   :  { %vm370_vm1 = vmor %vm285_vm15, %vm338_vm10  ;;  %vm171_vm8 = vcmp.lt.s32.totalorder %v837_v39, %v1199_v20  ;;  %v48_v45 = vadd.s32 72, %v1160_v1  ;;  %vm256_vm6 = vcmp.lt.s32.totalorder %v871_v7, %v1214_v27  ;;  %vm341_vm9 = vcmp.lt.s32.totalorder %v905_v23, %v1229_v33 }
  0x4f   :  { %vm455_vm4 = vmor %vm370_vm1, %vm423_vm11  ;;  %vm426_vm10 = vcmp.lt.s32.totalorder %v939_v42, %v1248_v40  ;;  %v973_v46 = vxor.u32 2147483648, %v475_v3  ;;  %v1007_v49 = vxor.u32 2147483648, %v560_v43  ;;  %v1041_v55 = vxor.u32 2147483648, %v645_v44 }
  0x50   :  { %vm540_vm3 = vmor %vm455_vm4, %vm508_vm0  ;;  %v67_v50 = vsub.s32 %v48_v45, %v1174_v6  ;;  %v136_v51 = vsub.s32 %v48_v45, %v1189_v13  ;;  %v221_v52 = vsub.s32 %v48_v45, %v1201_v21  ;;  %v306_v56 = vsub.s32 %v48_v45, %v1216_v28 }
  0x51   :  { %vm625_vm12 = vmor %vm540_vm3, %vm593_vm2  ;;  %v391_v57 = vsub.s32 %v48_v45, %v1231_v34  ;;  %v476_v58 = vsub.s32 %v48_v45, %v1251_v41  ;;  %v49_v61 = vadd.s32 80, %v1160_v1  ;;  %vm511_vm15 = vcmp.lt.s32.totalorder %v973_v46, %v1259_v47 }
  0x52   :  { %vm710_vm11 = vmor %vm625_vm12, %vm678_vm7  ;;  %v805_v15 = vxor.u32 2147483648, %v67_v50  ;;  %v839_v59 = vxor.u32 2147483648, %v136_v51  ;;  %v873_v62 = vxor.u32 2147483648, %v221_v52  ;;  %v561_v63 = vsub.s32 %v48_v45, %v1262_v48 }
  0x53   :  { %v1064_v4 = vsel %vm710_vm11, 1.0, %v1135_v22  ;;  %vm201_vm13 = vmor %vm102_vm5, %vm171_vm8  ;;  %vm596_vm1 = vcmp.lt.s32.totalorder %v1007_v49, %v1271_v53  ;;  %v907_v0 = vxor.u32 2147483648, %v306_v56  ;;  %v941_v8 = vxor.u32 2147483648, %v391_v57 }
  0x54   :  { %758 = vst [vmem:[#allocation7 + $0x38] sm:$0xff] %v1064_v4  ;;  %vm286_vm14 = vmor %vm201_vm13, %vm256_vm6  ;;  %v646_v9 = vsub.s32 %v48_v45, %v1273_v54  ;;  %vm681_vm4 = vcmp.lt.s32.totalorder %v1041_v55, %v1286_v60  ;;  %vm105_vm7 = vcmp.lt.s32.totalorder %v805_v15, %v1187_v12  ;;  %v975_v10 = vxor.u32 2147483648, %v476_v58 }
  0x55   :  { %vm371_vm0 = vmor %vm286_vm14, %vm341_vm9  ;;  %vm174_vm8 = vcmp.lt.s32.totalorder %v839_v59, %v1199_v20  ;;  %v68_v11 = vsub.s32 %v49_v61, %v1174_v6  ;;  %v137_v16 = vsub.s32 %v49_v61, %v1189_v13  ;;  %v222_v2 = vsub.s32 %v49_v61, %v1201_v21 }
  0x56   :  { %vm456_vm2 = vmor %vm371_vm0, %vm426_vm10  ;;  %vm259_vm6 = vcmp.lt.s32.totalorder %v873_v62, %v1214_v27  ;;  %v1009_v17 = vxor.u32 2147483648, %v561_v63  ;;  %v307_v5 = vsub.s32 %v49_v61, %v1216_v28  ;;  %v392_v18 = vsub.s32 %v49_v61, %v1231_v34 }
  0x57   :  { %vm541_vm5 = vmor %vm456_vm2, %vm511_vm15  ;;  %vm344_vm10 = vcmp.lt.s32.totalorder %v907_v0, %v1229_v33  ;;  %vm429_vm12 = vcmp.lt.s32.totalorder %v941_v8, %v1248_v40  ;;  %v1043_v19 = vxor.u32 2147483648, %v646_v9  ;;  %v1562_v24 = vadd.s32 88, %v1160_v1 }
  0x58   :  { %vm626_vm3 = vmor %vm541_vm5, %vm596_vm1  ;;  %v807_v26 = vxor.u32 2147483648, %v68_v11  ;;  %v841_v29 = vxor.u32 2147483648, %v137_v16  ;;  %v477_v30 = vsub.s32 %v49_v61, %v1251_v41  ;;  %vm514_vm14 = vcmp.lt.s32.totalorder %v975_v10, %v1259_v47 }
  0x59   :  { %vm711_vm9 = vmor %vm626_vm3, %vm681_vm4  ;;  %v875_v31 = vxor.u32 2147483648, %v222_v2  ;;  %v562_v32 = vsub.s32 %v49_v61, %v1262_v48  ;;  %vm599_vm0 = vcmp.lt.s32.totalorder %v1009_v17, %v1271_v53  ;;  %v909_v35 = vxor.u32 2147483648, %v307_v5 }
  0x5a   :  { %v1065_v25 = vsel %vm711_vm9, 1.0, %v1135_v22  ;;  %vm202_vm11 = vmor %vm105_vm7, %vm174_vm8  ;;  %v943_v36 = vxor.u32 2147483648, %v392_v18  ;;  %v647_v37 = vsub.s32 %v49_v61, %v1273_v54  ;;  %vm684_vm2 = vcmp.lt.s32.totalorder %v1043_v19, %v1286_v60 }
  0x5b   :  { %759 = vst [vmem:[#allocation7 + $0x40] sm:$0xff] %v1065_v25  ;;  %vm287_vm13 = vmor %vm202_vm11, %vm259_vm6  ;;  %v69_v38 = vsub.s32 %v1562_v24, %v1174_v6  ;;  %v138_v39 = vsub.s32 %v1562_v24, %v1189_v13  ;;  %vm108_vm7 = vcmp.lt.s32.totalorder %v807_v26, %v1187_v12  ;;  %vm177_vm5 = vcmp.lt.s32.totalorder %v841_v29, %v1199_v20 }
  0x5c   :  { %vm372_vm15 = vmor %vm287_vm13, %vm344_vm10  ;;  %v977_v3 = vxor.u32 2147483648, %v477_v30  ;;  %v223_v14 = vsub.s32 %v1562_v24, %v1201_v21  ;;  %vm262_vm3 = vcmp.lt.s32.totalorder %v875_v31, %v1214_v27  ;;  %v1011_v7 = vxor.u32 2147483648, %v562_v32 }
  0x5d   :  { %vm457_vm1 = vmor %vm372_vm15, %vm429_vm12  ;;  %v308_v23 = vsub.s32 %v1562_v24, %v1216_v28  ;;  %v393_v42 = vsub.s32 %v1562_v24, %v1231_v34  ;;  %vm347_vm9 = vcmp.lt.s32.totalorder %v909_v35, %v1229_v33  ;;  %vm432_vm10 = vcmp.lt.s32.totalorder %v943_v36, %v1248_v40 }
  0x5e   :  { %vm542_vm4 = vmor %vm457_vm1, %vm514_vm14  ;;  %v1045_v43 = vxor.u32 2147483648, %v647_v37  ;;  %v1595_v44 = vadd.s32 96, %v1160_v1  ;;  %v809_v46 = vxor.u32 2147483648, %v69_v38  ;;  %v843_v49 = vxor.u32 2147483648, %v138_v39 }
  0x5f   :  { %vm627_vm8 = vmor %vm542_vm4, %vm599_vm0  ;;  %v478_v50 = vsub.s32 %v1562_v24, %v1251_v41  ;;  %vm517_vm13 = vcmp.lt.s32.totalorder %v977_v3, %v1259_v47  ;;  %v877_v51 = vxor.u32 2147483648, %v223_v14  ;;  %v563_v52 = vsub.s32 %v1562_v24, %v1262_v48 }
  0x60   :  { %vm712_vm6 = vmor %vm627_vm8, %vm684_vm2  ;;  %vm602_vm15 = vcmp.lt.s32.totalorder %v1011_v7, %v1271_v53  ;;  %v911_v55 = vxor.u32 2147483648, %v308_v23  ;;  %v945_v56 = vxor.u32 2147483648, %v393_v42  ;;  %v648_v57 = vsub.s32 %v1562_v24, %v1273_v54 }
  0x61   :  { %v1066_v45 = vsel %vm712_vm6, 1.0, %v1135_v22  ;;  %vm203_vm12 = vmor %vm108_vm7, %vm177_vm5  ;;  %vm687_vm1 = vcmp.lt.s32.totalorder %v1045_v43, %v1286_v60  ;;  %v70_v58 = vsub.s32 %v1595_v44, %v1174_v6  ;;  %v139_v4 = vsub.s32 %v1595_v44, %v1189_v13 }
  0x62   :  { %760 = vst [vmem:[#allocation7 + $0x48] sm:$0xff] %v1066_v45  ;;  %vm288_vm11 = vmor %vm203_vm12, %vm262_vm3  ;;  %vm111_vm4 = vcmp.lt.s32.totalorder %v809_v46, %v1187_v12  ;;  %vm180_vm7 = vcmp.lt.s32.totalorder %v843_v49, %v1199_v20  ;;  %v979_v15 = vxor.u32 2147483648, %v478_v50  ;;  %v224_v59 = vsub.s32 %v1595_v44, %v1201_v21 }
  0x63   :  { %vm373_vm14 = vmor %vm288_vm11, %vm347_vm9  ;;  %vm265_vm8 = vcmp.lt.s32.totalorder %v877_v51, %v1214_v27  ;;  %v1013_v61 = vxor.u32 2147483648, %v563_v52  ;;  %v309_v62 = vsub.s32 %v1595_v44, %v1216_v28  ;;  %v394_v63 = vsub.s32 %v1595_v44, %v1231_v34 }
  0x64   :  { %vm458_vm0 = vmor %vm373_vm14, %vm432_vm10  ;;  %vm350_vm6 = vcmp.lt.s32.totalorder %v911_v55, %v1229_v33  ;;  %vm435_vm9 = vcmp.lt.s32.totalorder %v945_v56, %v1248_v40  ;;  %v1047_v0 = vxor.u32 2147483648, %v648_v57  ;;  %v1629_v8 = vadd.s32 104, %v1160_v1 }
  0x65   :  { %vm543_vm2 = vmor %vm458_vm0, %vm517_vm13  ;;  %v811_v10 = vxor.u32 2147483648, %v70_v58  ;;  %v845_v11 = vxor.u32 2147483648, %v139_v4  ;;  %v479_v16 = vsub.s32 %v1595_v44, %v1251_v41  ;;  %vm520_vm11 = vcmp.lt.s32.totalorder %v979_v15, %v1259_v47 }
  0x66   :  { %vm628_vm5 = vmor %vm543_vm2, %vm602_vm15  ;;  %v879_v2 = vxor.u32 2147483648, %v224_v59  ;;  %v564_v17 = vsub.s32 %v1595_v44, %v1262_v48  ;;  %vm605_vm14 = vcmp.lt.s32.totalorder %v1013_v61, %v1271_v53  ;;  %v913_v5 = vxor.u32 2147483648, %v309_v62 }
  0x67   :  { %vm713_vm3 = vmor %vm628_vm5, %vm687_vm1  ;;  %v947_v18 = vxor.u32 2147483648, %v394_v63  ;;  %v649_v19 = vsub.s32 %v1595_v44, %v1273_v54  ;;  %vm690_vm0 = vcmp.lt.s32.totalorder %v1047_v0, %v1286_v60  ;;  %v71_v24 = vsub.s32 %v1629_v8, %v1174_v6 }
  0x68   :  { %v1067_v9 = vsel %vm713_vm3, 1.0, %v1135_v22  ;;  %vm204_vm10 = vmor %vm111_vm4, %vm180_vm7  ;;  %v140_v25 = vsub.s32 %v1629_v8, %v1189_v13  ;;  %vm114_vm2 = vcmp.lt.s32.totalorder %v811_v10, %v1187_v12  ;;  %vm183_vm4 = vcmp.lt.s32.totalorder %v845_v11, %v1199_v20 }
  0x69   :  { %761 = vst [vmem:[#allocation7 + $0x50] sm:$0xff] %v1067_v9  ;;  %vm289_vm12 = vmor %vm204_vm10, %vm265_vm8  ;;  %v981_v26 = vxor.u32 2147483648, %v479_v16  ;;  %v225_v29 = vsub.s32 %v1629_v8, %v1201_v21  ;;  %vm268_vm5 = vcmp.lt.s32.totalorder %v879_v2, %v1214_v27  ;;  %v1015_v30 = vxor.u32 2147483648, %v564_v17 }
  0x6a   :  { %vm374_vm13 = vmor %vm289_vm12, %vm350_vm6  ;;  %v310_v31 = vsub.s32 %v1629_v8, %v1216_v28  ;;  %v395_v32 = vsub.s32 %v1629_v8, %v1231_v34  ;;  %vm353_vm3 = vcmp.lt.s32.totalorder %v913_v5, %v1229_v33  ;;  %vm438_vm6 = vcmp.lt.s32.totalorder %v947_v18, %v1248_v40 }
  0x6b   :  { %vm459_vm15 = vmor %vm374_vm13, %vm435_vm9  ;;  %v1049_v35 = vxor.u32 2147483648, %v649_v19  ;;  %v480_v36 = vsub.s32 %v1629_v8, %v1251_v41  ;;  %v813_v38 = vxor.u32 2147483648, %v71_v24  ;;  %v847_v39 = vxor.u32 2147483648, %v140_v25 }
  0x6c   :  { %vm544_vm1 = vmor %vm459_vm15, %vm520_vm11  ;;  %v53_v3 = vadd.s32 112, %v1160_v1  ;;  %vm523_vm12 = vcmp.lt.s32.totalorder %v981_v26, %v1259_v47  ;;  %v881_v14 = vxor.u32 2147483648, %v225_v29  ;;  %v565_v7 = vsub.s32 %v1629_v8, %v1262_v48 }
  0x6d   :  { %vm629_vm7 = vmor %vm544_vm1, %vm605_vm14  ;;  %vm608_vm13 = vcmp.lt.s32.totalorder %v1015_v30, %v1271_v53  ;;  %v915_v23 = vxor.u32 2147483648, %v310_v31  ;;  %v949_v42 = vxor.u32 2147483648, %v395_v32  ;;  %v650_v43 = vsub.s32 %v1629_v8, %v1273_v54 }
  0x6e   :  { %vm714_vm8 = vmor %vm629_vm7, %vm690_vm0  ;;  %vm693_vm15 = vcmp.lt.s32.totalorder %v1049_v35, %v1286_v60  ;;  %v72_v44 = vsub.s32 %v53_v3, %v1174_v6  ;;  %v141_v45 = vsub.s32 %v53_v3, %v1189_v13  ;;  %vm117_vm1 = vcmp.lt.s32.totalorder %v813_v38, %v1187_v12 }
  0x6f   :  { %v1068_v37 = vsel %vm714_vm8, 1.0, %v1135_v22  ;;  %vm205_vm9 = vmor %vm114_vm2, %vm183_vm4  ;;  %vm186_vm2 = vcmp.lt.s32.totalorder %v847_v39, %v1199_v20  ;;  %v983_v46 = vxor.u32 2147483648, %v480_v36  ;;  %v226_v49 = vsub.s32 %v53_v3, %v1201_v21 }
  0x70   :  { %762 = vst [vmem:[#allocation7 + $0x58] sm:$0xff] %v1068_v37  ;;  %vm290_vm10 = vmor %vm205_vm9, %vm268_vm5  ;;  %vm271_vm7 = vcmp.lt.s32.totalorder %v881_v14, %v1214_v27  ;;  %v1017_v50 = vxor.u32 2147483648, %v565_v7  ;;  %v311_v51 = vsub.s32 %v53_v3, %v1216_v28  ;;  %v396_v52 = vsub.s32 %v53_v3, %v1231_v34 }
  0x71   :  { %vm375_vm11 = vmor %vm290_vm10, %vm353_vm3  ;;  %vm356_vm8 = vcmp.lt.s32.totalorder %v915_v23, %v1229_v33  ;;  %vm441_vm3 = vcmp.lt.s32.totalorder %v949_v42, %v1248_v40  ;;  %v1051_v55 = vxor.u32 2147483648, %v650_v43  ;;  %v54_v56 = vadd.s32 120, %v1160_v1 }
  0x72   :  { %vm460_vm14 = vmor %vm375_vm11, %vm438_vm6  ;;  %v815_v58 = vxor.u32 2147483648, %v72_v44  ;;  %v849_v4 = vxor.u32 2147483648, %v141_v45  ;;  %v481_v15 = vsub.s32 %v53_v3, %v1251_v41  ;;  %vm526_vm10 = vcmp.lt.s32.totalorder %v983_v46, %v1259_v47 }
  0x73   :  { %vm545_vm0 = vmor %vm460_vm14, %vm523_vm12  ;;  %v883_v59 = vxor.u32 2147483648, %v226_v49  ;;  %v566_v61 = vsub.s32 %v53_v3, %v1262_v48  ;;  %vm611_vm11 = vcmp.lt.s32.totalorder %v1017_v50, %v1271_v53  ;;  %v917_v1 = vxor.u32 2147483648, %v311_v51 }
  0x74   :  { %vm630_vm4 = vmor %vm545_vm0, %vm608_vm13  ;;  %v951_v62 = vxor.u32 2147483648, %v396_v52  ;;  %v651_v63 = vsub.s32 %v53_v3, %v1273_v54  ;;  %vm696_vm14 = vcmp.lt.s32.totalorder %v1051_v55, %v1286_v60  ;;  %v73_v0 = vsub.s32 %v54_v56, %v1174_v6 }
  0x75   :  { %vm715_vm5 = vmor %vm630_vm4, %vm693_vm15  ;;  %v142_v8 = vsub.s32 %v54_v56, %v1189_v13  ;;  %vm120_vm0 = vcmp.lt.s32.totalorder %v815_v58, %v1187_v12  ;;  %v985_v9 = vxor.u32 2147483648, %v481_v15  ;;  %v227_v10 = vsub.s32 %v54_v56, %v1201_v21 }
  0x76   :  { %v1069_v57 = vsel %vm715_vm5, 1.0, %v1135_v22  ;;  %vm206_vm6 = vmor %vm117_vm1, %vm186_vm2  ;;  %vm189_vm1 = vcmp.lt.s32.totalorder %v849_v4, %v1199_v20  ;;  %vm274_vm4 = vcmp.lt.s32.totalorder %v883_v59, %v1214_v27  ;;  %v1019_v11 = vxor.u32 2147483648, %v566_v61 }
  0x77   :  { %763 = vst [vmem:[#allocation7 + $0x60] sm:$0xff] %v1069_v57  ;;  %vm291_vm9 = vmor %vm206_vm6, %vm271_vm7  ;;  %v312_v16 = vsub.s32 %v54_v56, %v1216_v28  ;;  %vm359_vm5 = vcmp.lt.s32.totalorder %v917_v1, %v1229_v33  ;;  %v1053_v6 = vxor.u32 2147483648, %v651_v63  ;;  %v397_v13 = vsub.s32 %v54_v56, %v1231_v34 }
  0x78   :  { %vm376_vm12 = vmor %vm291_vm9, %vm356_vm8  ;;  %vm444_vm8 = vcmp.lt.s32.totalorder %v951_v62, %v1248_v40  ;;  %v817_v17 = vxor.u32 2147483648, %v73_v0  ;;  %v851_v5 = vxor.u32 2147483648, %v142_v8  ;;  %v482_v21 = vsub.s32 %v54_v56, %v1251_v41 }
  0x79   :  { %vm461_vm13 = vmor %vm376_vm12, %vm441_vm3  ;;  %vm529_vm9 = vcmp.lt.s32.totalorder %v985_v9, %v1259_v47  ;;  %v885_v28 = vxor.u32 2147483648, %v227_v10  ;;  %v567_v18 = vsub.s32 %v54_v56, %v1262_v48  ;;  %vm614_vm12 = vcmp.lt.s32.totalorder %v1019_v11, %v1271_v53 }
  0x7a   :  { %vm546_vm15 = vmor %vm461_vm13, %vm526_vm10  ;;  %v919_v19 = vxor.u32 2147483648, %v312_v16  ;;  %v652_v34 = vsub.s32 %v54_v56, %v1273_v54  ;;  %vm699_vm13 = vcmp.lt.s32.totalorder %v1053_v6, %v1286_v60  ;;  %v953_v24 = vxor.u32 2147483648, %v397_v13 }
  0x7b   :  { %vm631_vm2 = vmor %vm546_vm15, %vm611_vm11  ;;  %vm123_vm15 = vcmp.lt.s32.totalorder %v817_v17, %v1187_v12  ;;  %v987_v41 = vxor.u32 2147483648, %v482_v21  ;;  %v1021_v48 = vxor.u32 2147483648, %v567_v18 }
  0x7c   :  { %vm716_vm7 = vmor %vm631_vm2, %vm696_vm14  ;;  %vm277_vm2 = vcmp.lt.s32.totalorder %v885_v28, %v1214_v27  ;;  %v1055_v54 = vxor.u32 2147483648, %v652_v34 }
  0x7d   :  { %v1070_v2 = vsel %vm716_vm7, 1.0, %v1135_v22  ;;  %vm207_vm3 = vmor %vm120_vm0, %vm189_vm1  ;;  %vm192_vm0 = vcmp.lt.s32.totalorder %v851_v5, %v1199_v20  ;;  %vm362_vm7 = vcmp.lt.s32.totalorder %v919_v19, %v1229_v33 }
  0x7e   :  { %764 = vst [vmem:[#allocation7 + $0x68] sm:$0xff] %v1070_v2  ;;  %vm292_vm6 = vmor %vm207_vm3, %vm274_vm4 }
  0x7f   :  { %vm377_vm10 = vmor %vm292_vm6, %vm359_vm5  ;;  %vm532_vm6 = vcmp.lt.s32.totalorder %v987_v41, %v1259_v47 }
  0x80   :  { %vm462_vm11 = vmor %vm377_vm10, %vm444_vm8  ;;  %vm447_vm8 = vcmp.lt.s32.totalorder %v953_v24, %v1248_v40  ;;  %vm617_vm10 = vcmp.lt.s32.totalorder %v1021_v48, %v1271_v53 }
  0x81   :  { %vm547_vm14 = vmor %vm462_vm11, %vm529_vm9  ;;  %vm702_vm11 = vcmp.lt.s32.totalorder %v1055_v54, %v1286_v60 }
  0x82   :  { %vm632_vm1 = vmor %vm547_vm14, %vm614_vm12 }
  0x83   :  { %vm717_vm4 = vmor %vm632_vm1, %vm699_vm13 }
  0x84   :  { %v1071_v25 = vsel %vm717_vm4, 1.0, %v1135_v22  ;;  %vm208_vm5 = vmor %vm123_vm15, %vm192_vm0 }
  0x85   :  { %765 = vst [vmem:[#allocation7 + $0x70] sm:$0xff] %v1071_v25  ;;  %vm293_vm3 = vmor %vm208_vm5, %vm277_vm2 }
  0x86   :  { %vm378_vm9 = vmor %vm293_vm3, %vm362_vm7 }
  0x87   :  { %vm463_vm12 = vmor %vm378_vm9, %vm447_vm8 }
  0x88   :  { %vm548_vm13 = vmor %vm463_vm12, %vm532_vm6 }
  0x89   :  { %vm633_vm14 = vmor %vm548_vm13, %vm617_vm10 }
  0x8a   :  { %vm718_vm15 = vmor %vm633_vm14, %vm702_vm11 }
  0x8b   :  { %v1072_v12 = vsel %vm718_vm15, 1.0, %v1135_v22 }
  0x8c   :  { %766 = vst [vmem:[#allocation7 + $0x78] sm:$0xff] %v1072_v12 }
  0x8d   :  { %779 = dma.vmem_to_hbm [thread:$0]  %s772_s4, 2048, %s774_s7, [#allocation3], %s1137_s8, %s1137_s8, %s1138_s9  }
  0x8e   :  { %1131 = dma.done.wait [#allocation3], 2048  }
  0x8f   :  { %1132 = vsyncadd [#allocation3], 4294965248 }
  0x90   :  { %784 = vsyncpa [#allocation3], 1 }
  0x91   :  { %785 = vsyncpa [#allocation4], 1 }
  0x92   :  { %786 = vsyncpa [#allocation6], 1 }

</bundles_post_ra>
